<compile_context>
chip_gen: v5e
topology: v5e:2x2
jax: 0.10.0
libtpu: 0.0.40
codegen_flags: <defaults>
</compile_context>

<pallas_src>
import jax
import jax.numpy as jnp
from jax.experimental import pallas as pl
from jax.experimental.pallas import tpu as pltpu


def output_layer_kernel(x_ref, mask_ref, w_ref, b_ref, o_ref):
    """One (tm, tn) output tile: (x * dropout_mask) @ W + b."""
    x = x_ref[...] * mask_ref[...]                         # inverted dropout, input dtype
    acc = jnp.dot(x, w_ref[...], preferred_element_type=jnp.float32)
    o_ref[...] = (acc + b_ref[...]).astype(o_ref.dtype)    # bias (f32) broadcasts over rows


def output_layer(x, w_t, b, *, p, rng_key, training=True, tm=256, tn=1024):
    """x: [batch, seq, hidden], w_t: [hidden, vocab], b: [vocab] -> [batch, seq, vocab]."""
    batch, seq, hidden = x.shape
    vocab = w_t.shape[1]
    m = batch * seq

    x2 = x.reshape(m, hidden)
    b2 = b.reshape(1, vocab).astype(jnp.float32)

    # Inverted dropout mask (PyTorch training semantics): keep with prob 1-p and scale
    # kept values by 1/(1-p).  Precomputed with a jax.random key for portability.
    if training and p > 0.0:
        keep = jax.random.uniform(rng_key, (m, hidden)) >= jnp.float32(p)
        mask = keep.astype(x.dtype) * jnp.asarray(1.0 / (1.0 - p), dtype=x.dtype)
    else:
        mask = jnp.ones((m, hidden), dtype=x.dtype)

    tm = min(tm, m)
    tn = min(tn, vocab)
    grid = (pl.cdiv(m, tm), pl.cdiv(vocab, tn))

    itemsize = jnp.dtype(x.dtype).itemsize
    cost = pl.CostEstimate(
        flops=2 * m * hidden * vocab,
        transcendentals=0,
        bytes_accessed=(2 * m * hidden * itemsize          # x + mask
                        + hidden * vocab * jnp.dtype(w_t.dtype).itemsize
                        + vocab * 4                        # bias (f32)
                        + m * vocab * itemsize),           # output
    )

    out = pl.pallas_call(
        output_layer_kernel,
        out_shape=jax.ShapeDtypeStruct((m, vocab), x.dtype),
        grid_spec=pl.GridSpec(
            grid=grid,
            in_specs=[
                pl.BlockSpec((tm, hidden), lambda i, j: (i, 0)),   # x tile
                pl.BlockSpec((tm, hidden), lambda i, j: (i, 0)),   # dropout mask tile
                pl.BlockSpec((hidden, tn), lambda i, j: (0, j)),   # weight tile (streamed)
                pl.BlockSpec((1, tn), lambda i, j: (0, j)),        # bias tile
            ],
            out_specs=pl.BlockSpec((tm, tn), lambda i, j: (i, j)),
        ),
        compiler_params=pltpu.CompilerParams(
            dimension_semantics=("parallel", "parallel"),
            vmem_limit_bytes=48 * 1024 * 1024,   # fits v5e default-scoped / v6e / v7x (64 MiB phys)
        ),
        cost_estimate=cost,
    )(x2, mask, w_t, b2)

    return out.reshape(batch, seq, vocab)


if __name__ == "__main__":
    # Module config (small, consistent with OutputLayer(hidden_size, vocab_size, p))
    batch, seq = 2, 8
    hidden_size = 32
    vocab_size = 128
    p = 0.1

    key = jax.random.PRNGKey(0)
    k_x, k_w, k_drop = jax.random.split(key, 3)

    # Input activations
    x = jax.random.normal(k_x, (batch, seq, hidden_size), dtype=jnp.float32)

    # Deterministic parameter init mirroring init_weights_uniform():
    #   fc.weight ~ U(-0.1, 0.1) with shape [vocab, hidden]; fc.bias = 0
    w = jax.random.uniform(k_w, (vocab_size, hidden_size),
                           minval=-0.1, maxval=0.1, dtype=jnp.float32)
    b = jnp.zeros((vocab_size,), dtype=jnp.float32)
    w_t = w.T  # [hidden, vocab] layout for the kernel

    out = output_layer(x, w_t, b, p=p, rng_key=k_drop)
    jax.block_until_ready(out)

    assert out.shape == (batch, seq, vocab_size), out.shape
    assert bool(jnp.all(jnp.isfinite(out)))
    print("KERNEL_OK")
</pallas_src>

<mosaic_0001>
module attributes {stable_mosaic.version = 11 : i64} {
  func.func @output_layer_kernel(%arg0: i32, %arg1: i32, %arg2: memref<16x32xf32, #tpu.memory_space<vmem>>, %arg3: memref<16x32xf32, #tpu.memory_space<vmem>>, %arg4: memref<32x128xf32, #tpu.memory_space<vmem>>, %arg5: memref<1x128xf32, #tpu.memory_space<vmem>>, %arg6: memref<16x128xf32, #tpu.memory_space<vmem>>) attributes {dimension_semantics = [#tpu.dimension_semantics<parallel>, #tpu.dimension_semantics<parallel>], iteration_bounds = array<i64: 1, 1>, scalar_prefetch = 0 : i64, scratch_operands = 0 : i64, tpu.core_type = #tpu.core_type<tc>, window_params = [{transform_indices = @transform_0, window_bounds = array<i64: 16, 32>}, {transform_indices = @transform_1, window_bounds = array<i64: 16, 32>}, {transform_indices = @transform_2, window_bounds = array<i64: 32, 128>}, {transform_indices = @transform_3, window_bounds = array<i64: 1, 128>}, {transform_indices = @transform_4, window_bounds = array<i64: 16, 128>}]} {
    %c0 = arith.constant 0 : index
    %c0_0 = arith.constant 0 : index
    %0 = vector.load %arg2[%c0, %c0_0] : memref<16x32xf32, #tpu.memory_space<vmem>>, vector<16x32xf32>
    %c0_1 = arith.constant 0 : index
    %c0_2 = arith.constant 0 : index
    %1 = vector.load %arg3[%c0_1, %c0_2] : memref<16x32xf32, #tpu.memory_space<vmem>>, vector<16x32xf32>
    %2 = arith.mulf %0, %1 : vector<16x32xf32>
    %c0_3 = arith.constant 0 : index
    %c0_4 = arith.constant 0 : index
    %3 = vector.load %arg4[%c0_3, %c0_4] : memref<32x128xf32, #tpu.memory_space<vmem>>, vector<32x128xf32>
    %cst = arith.constant dense<0.000000e+00> : vector<16x128xf32>
    %4 = tpu.matmul %2, %3, %cst {dimension_numbers = #tpu.dot_dimension_numbers<[1], [0], [0], [1], [0, 0, 1, 1], [], []>} : vector<16x32xf32>, vector<32x128xf32>, vector<16x128xf32> -> vector<16x128xf32>
    %c0_5 = arith.constant 0 : index
    %c0_6 = arith.constant 0 : index
    %5 = vector.load %arg5[%c0_5, %c0_6] : memref<1x128xf32, #tpu.memory_space<vmem>>, vector<1x128xf32>
    %6 = vector.broadcast %5 : vector<1x128xf32> to vector<16x128xf32>
    %7 = arith.addf %4, %6 : vector<16x128xf32>
    %c0_7 = arith.constant 0 : index
    %c0_8 = arith.constant 0 : index
    %8 = vector.load %arg6[%c0_7, %c0_8] : memref<16x128xf32, #tpu.memory_space<vmem>>, vector<16x128xf32>
    tpu.vector_store %arg6[%c0_7, %c0_8], %7 {strides = array<i32>} : memref<16x128xf32, #tpu.memory_space<vmem>>, vector<16x128xf32>,
    return
  }
  func.func @transform_0(%arg0: i32, %arg1: i32) -> (i32, i32) {
    %c0_i32 = arith.constant 0 : i32
    %c0_i32_0 = arith.constant 0 : i32
    return %arg0, %c0_i32 : i32, i32
  }
  func.func @transform_1(%arg0: i32, %arg1: i32) -> (i32, i32) {
    %c0_i32 = arith.constant 0 : i32
    %c0_i32_0 = arith.constant 0 : i32
    return %arg0, %c0_i32 : i32, i32
  }
  func.func @transform_2(%arg0: i32, %arg1: i32) -> (i32, i32) {
    %c0_i32 = arith.constant 0 : i32
    %c0_i32_0 = arith.constant 0 : i32
    return %c0_i32, %arg1 : i32, i32
  }
  func.func @transform_3(%arg0: i32, %arg1: i32) -> (i32, i32) {
    %c0_i32 = arith.constant 0 : i32
    %c0_i32_0 = arith.constant 0 : i32
    return %c0_i32, %arg1 : i32, i32
  }
  func.func @transform_4(%arg0: i32, %arg1: i32) -> (i32, i32) {
    %c0_i32 = arith.constant 0 : i32
    return %arg0, %arg1 : i32, i32
  }
}

</mosaic_0001>

<bundles_post_ra>
// kernel: tpu_custom_call.1
= control target key start
LH: loop header
LB: loop body
LE: loop exit
PB: predicated region body
PF: predicated region fallthrough
CT: control target
= control target key end

     0   :  { %9 = vsyncpa [#allocation3], 0  ;;  %s304_s0 = inlined_call_operand.hbm [shape: f32[16,32], index: 0, kind: input, shape index: {}]   ;;  %s305_s1 = inlined_call_operand.hbm [shape: f32[16,32], index: 1, kind: input, shape index: {}]   ;;  %s306_s2 = inlined_call_operand.hbm [shape: f32[32,128], index: 2, kind: input, shape index: {}]   ;;  %s307_s3 = inlined_call_operand.vmem [shape: f32[1,128], index: 3, kind: input, shape index: {}]   ;;  %s308_s4 = inlined_call_operand.hbm [shape: f32[16,128], index: 4, kind: output, shape index: {}]  }
   0x1   :  { %10 = vsyncpa [#allocation6], 0 }
   0x2   :  { %11 = vsyncpa [#allocation4], 0  ;;  %s29_s17 = sshll.u32 %s305_s1, 4  ;;  %s246_s18 = smov [#allocation5]   ;;  %s30_s17 = int_to_ptr.hbm [resolvable:$true] %s29_s17 }
   0x3   :  { %s31_s19 = sshll.u32 %s246_s18, 4  ;;  %s16_s22 = sshll.u32 %s304_s0, 4  ;;  %s32_s19 = int_to_ptr.vmem [resolvable:$true] %s31_s19  ;;  %s17_s22 = int_to_ptr.hbm [resolvable:$true] %s16_s22 }
   0x4   :  { %s247_s23 = smov 128   ;;  %s248_s24 = smov 8  }
   0x5   :  { %37 = dma.hbm_to_vmem [thread:$0]  %s30_s17, 256, %s32_s19, [#allocation6], %s247_s23, %s247_s23, %s248_s24  }
   0x6   :  { %s249_s25 = smov [#allocation2]   ;;  %s42_s1 = sshll.u32 %s306_s2, 4  ;;  %s43_s1 = int_to_ptr.hbm [resolvable:$true] %s42_s1 }
   0x7   :  { %s18_s26 = sshll.u32 %s249_s25, 4  ;;  %s250_s0 = smov [#allocation7]   ;;  %s19_s26 = int_to_ptr.vmem [resolvable:$true] %s18_s26 }
   0x8   :  { %24 = dma.hbm_to_vmem [thread:$0]  %s17_s22, 256, %s19_s26, [#allocation3], %s247_s23, %s247_s23, %s248_s24  }
   0x9   :  { %s44_s29 = sshll.u32 %s250_s0, 4  ;;  %s45_s29 = int_to_ptr.vmem [resolvable:$true] %s44_s29 }
   0xa   :  { %50 = dma.hbm_to_vmem [thread:$0]  %s43_s1, 512, %s45_s29, [#allocation6], %s247_s23, %s247_s23, %s248_s24  }
   0xb   :  { %240 = dma.done.wait [#allocation3], 256  }
   0xc   :  { %241 = vsyncadd [#allocation3], 4294967040 }
   0xd   :  { %242 = dma.done.wait [#allocation6], 768  }
   0xe   :  { %243 = vsyncadd [#allocation6], 4294966528  ;;  %v74_v0 = vld [vmem:[#allocation7 + $0x18] sm:$0xff]  ;;  %v73_v1 = vld [vmem:[#allocation7 + $0x10] sm:$0xff]  ;;  %vm79_vm0 = vcmask 261120   ;;  %s251_s5 = smov [#allocation8]  }
   0xf   :  { %98 = vmatpush.msra.mxu0 %v74_v0  ;;  %133 = vmatpush.msra.mxu1 %v74_v0  ;;  %v72_v2 = vld [vmem:[#allocation7 + $0x8] sm:$0xff]  ;;  %v65_v3 = vld [vmem:[#allocation2] sm:$0xff]  ;;  %v67_v4 = vld [vmem:[#allocation5] sm:$0xff]  ;;  %s115_s6 = sshll.u32 %s251_s5, 4  ;;  %s117_s9 = sshll.u32 %s308_s4, 4  ;;  %s116_s6 = int_to_ptr.vmem [resolvable:$true] %s115_s6  ;;  %s118_s9 = int_to_ptr.hbm [resolvable:$true] %s117_s9 }
  0x10   :  { %v66_v5 = vld [vmem:[#allocation2 + $0x8] sm:$0xff]  ;;  %v68_v6 = vld [vmem:[#allocation5 + $0x8] sm:$0xff]  ;;  %v71_v7 = vld [vmem:[#allocation7] sm:$0xff]  ;;  %v69_v8 = vmul.f32 %v67_v4, %v65_v3 }
  0x11   :  { %99 = vmatpush.msra.mxu0 %v73_v1  ;;  %134 = vmatpush.msra.mxu1 %v73_v1  ;;  %v70_v9 = vmul.f32 %v68_v6, %v66_v5  ;;  %v143_v10 = vld [vmem:[%s307_s3] ss:$0 sm:$0xff] }
  0x13   :  { %100 = vmatpush.msra.mxu0 %v72_v2  ;;  %135 = vmatpush.msra.mxu1 %v72_v2 }
  0x15   :  { %101 = vmatpush.msra.mxu0 %v71_v7  ;;  %136 = vmatpush.msra.mxu1 %v71_v7 }
  0x16   :  { %131 = vmatmul.msk.f32.vlgmr.msra.gmra.mxu0 %vm79_vm0, %v69_v8  ;;  %132 = vmatmul.msk.f32.vlgmr.msra.gmra.mxu1 %vm79_vm0, %v70_v9 }
  0x93   :  { %v103_v11 = vpop.f32.mrf.mxu0  ;;  %v106_v12 = vpop.f32.mrf.mxu1 }
  0x94   :  { %v104_v13 = vadd.f32 %v143_v10, %v103_v11  ;;  %v107_v14 = vadd.f32 %v143_v10, %v106_v12 }
  0x96   :  { %109 = vst [vmem:[#allocation8] sm:$0xff] %v104_v13 }
  0x97   :  { %110 = vst [vmem:[#allocation8 + $0x8] sm:$0xff] %v107_v14 }
  0x98   :  { %123 = dma.vmem_to_hbm [thread:$0]  %s116_s6, 256, %s118_s9, [#allocation4], %s247_s23, %s247_s23, %s248_s24  }
  0x99   :  { %244 = dma.done.wait [#allocation4], 256  }
  0x9a   :  { %245 = vsyncadd [#allocation4], 4294967040 }
  0x9b   :  { %128 = vsyncpa [#allocation3], 1 }
  0x9c   :  { %129 = vsyncpa [#allocation6], 1 }
  0x9d   :  { %130 = vsyncpa [#allocation4], 1 }

</bundles_post_ra>
